<compile_context>
chip_gen: v7x
topology: tpu7x:2x2x1
jax: 0.10.0
libtpu: 0.0.40
codegen_flags: <defaults>
</compile_context>

<pallas_src>
import functools

import jax
import jax.numpy as jnp
from jax.experimental import pallas as pl
from jax.experimental.pallas import tpu as pltpu


def _focal_pow(one_minus_pt, gamma):
    """(1 - pt)**gamma; integer gamma becomes a short multiply chain (no pow)."""
    if isinstance(gamma, int) and gamma >= 0:
        if gamma == 0:
            return jnp.ones_like(one_minus_pt)
        focal = one_minus_pt
        for _ in range(gamma - 1):
            focal = focal * one_minus_pt
        return focal
    # float gamma: clamp so pt == 1 + ulp can never produce NaN from a negative base
    return jnp.maximum(one_minus_pt, 0.0) ** gamma


def _prep_alpha(alpha, num_classes):
    """Mirror the PyTorch constructor: scalar -> [a, 1-a], list -> per-class weights."""
    if alpha is None:
        return None
    if isinstance(alpha, (float, int)):
        vec = jnp.array([float(alpha), 1.0 - float(alpha)], dtype=jnp.float32)
    else:
        vec = jnp.asarray(alpha, dtype=jnp.float32).reshape(-1)
    if vec.shape[0] != num_classes:
        raise ValueError("alpha must provide one weight per class")
    return vec


# ---------------------------------------------------------------------------
# N-D (N, C, ...) path: pixels lane-dense, class axis unrolled into C slabs.
# ---------------------------------------------------------------------------


def _focal_loss_kernel(x_ref, t_ref, *rest, gamma, num_classes, hw, tile_elems,
                       tiles_per_split, total_tiles, has_alpha, ragged):
    if has_alpha:
        a_ref, out_ref = rest            # a_ref: (C,) float32 in SMEM
    else:
        a_ref = None
        (out_ref,) = rest

    j = pl.program_id(2)

    # Init this (batch, split)'s resident partial-sum block on its first spatial tile.
    @pl.when(j == 0)
    def _():
        out_ref[...] = jnp.zeros_like(out_ref)

    tgt = t_ref[0].astype(jnp.int32)                     # (rows, lanes)
    # Unroll the class axis into C full lane-dense slabs: reductions over classes become
    # elementwise VPU chains (no cross-sublane XLU work).
    xs = [x_ref[0, k].astype(jnp.float32) for k in range(num_classes)]

    m = xs[0]
    for k in range(1, num_classes):
        m = jnp.maximum(m, xs[k])

    sum_exp = None
    z_t = None      # (x - max) at the target class
    e_t = None      # exp(x - max) at the target class (reused: no second exp for pt)
    at = None       # alpha[target]
    for k in range(num_classes):
        z_k = xs[k] - m
        e_k = jnp.exp(z_k)
        sum_exp = e_k if sum_exp is None else sum_exp + e_k
        sel = tgt == k
        z_t = jnp.where(sel, z_k, 0.0) if z_t is None else jnp.where(sel, z_k, z_t)
        e_t = jnp.where(sel, e_k, 0.0) if e_t is None else jnp.where(sel, e_k, e_t)
        if has_alpha:
            a_k = a_ref[k]                               # scalar read from SMEM
            at = jnp.where(sel, a_k, 0.0) if at is None else jnp.where(sel, a_k, at)

    logpt = z_t - jnp.log(sum_exp)                       # log p_t
    pt = e_t / sum_exp                                   # exact; reuses exp(z)
    focal = _focal_pow(1.0 - pt, gamma)
    logpt_w = logpt * at if has_alpha else logpt
    loss = -focal * logpt_w                              # (rows, lanes)

    if ragged:
        rows, lanes = loss.shape
        s = pl.program_id(1)
        tile_idx = s * tiles_per_split + j

        # Only the globally-last tile overhangs the array: mask its garbage elements with a
        # select so NaN/Inf in the overhang never reach the reduction.
        @pl.when(tile_idx == total_tiles - 1)
        def _():
            flat = (tile_idx * tile_elems
                    + jax.lax.broadcasted_iota(jnp.int32, (rows, lanes), 0) * lanes
                    + jax.lax.broadcasted_iota(jnp.int32, (rows, lanes), 1))
            out_ref[...] += jnp.sum(jnp.where(flat < hw, loss, 0.0))

        @pl.when(tile_idx != total_tiles - 1)
        def _():
            out_ref[...] += jnp.sum(loss)
    else:
        out_ref[...] += jnp.sum(loss)


def _focal_loss_nd(logits, target, gamma, alpha_vec, size_average,
                   tile_bytes, vmem_limit_bytes):
    n, c = logits.shape[0], logits.shape[1]
    hw = 1
    for d in logits.shape[2:]:
        hw *= d

    x3 = logits.reshape(n, c, hw)                    # free reshape: no extra HBM pass
    tgt = target if target.dtype == jnp.int32 else target.astype(jnp.int32)
    t2 = tgt.reshape(n, hw)

    itemsize = jnp.dtype(logits.dtype).itemsize

    if hw % 128 == 0:
        # Repack pixels onto (rows, 128): full 8x128 vregs for all elementwise work.
        rows_total = hw // 128
        ts_cap = max(8, (tile_bytes // (itemsize * c * 128)) // 8 * 8)
        ts = rows_total if rows_total <= ts_cap else ts_cap
        n_j = -(-rows_total // ts)
        ragged = n_j > 1 and (rows_total % ts) != 0
        x_nd = x3.reshape(n, c, rows_total, 128)
        t_nd = t2.reshape(n, rows_total, 128)
        tile_rows, tile_lanes = ts, 128
        repacked = True
    else:
        # Fallback: pixels on the lane axis only.  No wrapper-side pad; last tile masked.
        tl_cap = max(128, (tile_bytes // (itemsize * c)) // 128 * 128)
        tl = hw if hw <= tl_cap else tl_cap
        n_j = -(-hw // tl)
        ragged = n_j > 1 and (hw % tl) != 0
        x_nd = x3.reshape(n, c, 1, hw)
        t_nd = t2.reshape(n, 1, hw)
        tile_rows, tile_lanes = 1, tl
        repacked = False

    # Spatial "parallel" split: with 2 TensorCores (v7x) this keeps both busy even when
    # N == 1.  On single-core chips the extra axis just serializes (same total step count).
    splits = 2 if (n_j >= 2 and n_j % 2 == 0) else 1
    tps = n_j // splits

    if repacked:
        x_spec = pl.BlockSpec((1, c, tile_rows, tile_lanes),
                              lambda i, s, j: (i, 0, s * tps + j, 0))
        t_spec = pl.BlockSpec((1, tile_rows, tile_lanes),
                              lambda i, s, j: (i, s * tps + j, 0))
    else:
        x_spec = pl.BlockSpec((1, c, tile_rows, tile_lanes),
                              lambda i, s, j: (i, 0, 0, s * tps + j))
        t_spec = pl.BlockSpec((1, tile_rows, tile_lanes),
                              lambda i, s, j: (i, 0, s * tps + j))

    in_specs = [x_spec, t_spec]
    args = [x_nd, t_nd]
    has_alpha = alpha_vec is not None
    if has_alpha:
        in_specs.append(pl.BlockSpec(memory_space=pltpu.MemorySpace.SMEM))
        args.append(alpha_vec)

    kernel = functools.partial(
        _focal_loss_kernel,
        gamma=gamma, num_classes=c, hw=hw,
        tile_elems=tile_rows * tile_lanes,
        tiles_per_split=tps, total_tiles=n_j,
        has_alpha=has_alpha, ragged=ragged)

    partials = pl.pallas_call(
        kernel,
        out_shape=jax.ShapeDtypeStruct((n * splits, 1, 1), jnp.float32),
        grid_spec=pltpu.PrefetchScalarGridSpec(
            num_scalar_prefetch=0,
            grid=(n, splits, tps),
            in_specs=in_specs,
            out_specs=pl.BlockSpec((1, 1, 1),
                                   lambda i, s, j: (i * splits + s, 0, 0)),
        ),
        compiler_params=pltpu.CompilerParams(
            dimension_semantics=("parallel", "parallel", "arbitrary"),
            vmem_limit_bytes=vmem_limit_bytes),
    )(*args)

    total = jnp.sum(partials)
    if size_average:
        return total / jnp.float32(n * hw)
    return total


# ---------------------------------------------------------------------------
# 2-D (M, C) path: tiled row-major on-chip, no wrapper-side HBM transpose.
# ---------------------------------------------------------------------------


def _focal_loss_2d_kernel(x_ref, t_ref, *rest, gamma, m_total, tile_m,
                          has_alpha, ragged):
    if has_alpha:
        a_ref, out_ref = rest            # a_ref: (1, C) float32
    else:
        a_ref = None
        (out_ref,) = rest

    x = x_ref[...].astype(jnp.float32)               # (tile_m, C) — classes on lanes
    tgt = t_ref[...].astype(jnp.int32)               # (tile_m, 1)

    mx = jnp.max(x, axis=1, keepdims=True)
    z = x - mx
    e = jnp.exp(z)
    sum_exp = jnp.sum(e, axis=1, keepdims=True)
    onehot = jax.lax.broadcasted_iota(jnp.int32, x.shape, 1) == tgt
    z_t = jnp.sum(jnp.where(onehot, z, 0.0), axis=1, keepdims=True)
    e_t = jnp.sum(jnp.where(onehot, e, 0.0), axis=1, keepdims=True)

    logpt = z_t - jnp.log(sum_exp)
    pt = e_t / sum_exp                               # reuses exp(z); no second exp
    focal = _focal_pow(1.0 - pt, gamma)
    if has_alpha:
        at = jnp.sum(jnp.where(onehot, a_ref[...].astype(jnp.float32), 0.0),
                     axis=1, keepdims=True)
        logpt = logpt * at
    loss = -focal * logpt                            # (tile_m, 1)

    if ragged:
        row = (jax.lax.broadcasted_iota(jnp.int32, loss.shape, 0)
               + pl.program_id(0) * tile_m)
        loss = jnp.where(row < m_total, loss, 0.0)   # select-mask ragged last tile

    out_ref[...] = jnp.sum(loss) + jnp.zeros_like(out_ref)


def _focal_loss_2d(logits, target, gamma, alpha_vec, size_average,
                   tile_bytes, vmem_limit_bytes):
    m, c = logits.shape
    tgt = target if target.dtype == jnp.int32 else target.astype(jnp.int32)
    t2 = tgt.reshape(m, 1)

    itemsize = jnp.dtype(logits.dtype).itemsize
    tm_cap = max(8, (tile_bytes // (itemsize * c)) // 8 * 8)
    tm = m if m <= tm_cap else tm_cap
    n_j = -(-m // tm)
    ragged = n_j > 1 and (m % tm) != 0

    in_specs = [pl.BlockSpec((tm, c), lambda j: (j, 0)),
                pl.BlockSpec((tm, 1), lambda j: (j, 0))]
    args = [logits, t2]
    has_alpha = alpha_vec is not None
    if has_alpha:
        in_specs.append(pl.BlockSpec((1, c), lambda j: (0, 0)))
        args.append(alpha_vec.reshape(1, c))

    kernel = functools.partial(
        _focal_loss_2d_kernel, gamma=gamma, m_total=m, tile_m=tm,
        has_alpha=has_alpha, ragged=ragged)

    partials = pl.pallas_call(
        kernel,
        out_shape=jax.ShapeDtypeStruct((n_j, 1, 1), jnp.float32),
        grid_spec=pltpu.PrefetchScalarGridSpec(
            num_scalar_prefetch=0,
            grid=(n_j,),
            in_specs=in_specs,
            out_specs=pl.BlockSpec((1, 1, 1), lambda j: (j, 0, 0))),
        compiler_params=pltpu.CompilerParams(
            dimension_semantics=("parallel",),
            vmem_limit_bytes=vmem_limit_bytes),
    )(*args)

    total = jnp.sum(partials)
    if size_average:
        return total / jnp.float32(m)
    return total


# ---------------------------------------------------------------------------
# Public entry point + pure-JAX reference.
# ---------------------------------------------------------------------------


def focal_loss(logits, target, gamma=2, alpha=None, size_average=True,
               tile_bytes=4 << 20, vmem_limit_bytes=48 * 1024 * 1024):
    """Pallas TPU FocalLoss forward.

    logits: (N, C, H, W) / any (N, C, ...) or 2-D (M, C); target: integer class ids
    (one per pixel / sample).  Semantics match the PyTorch module's forward.
    """
    c = logits.shape[1]
    alpha_vec = _prep_alpha(alpha, c)
    if logits.ndim > 2:
        return _focal_loss_nd(logits, target, gamma, alpha_vec, size_average,
                              tile_bytes, vmem_limit_bytes)
    return _focal_loss_2d(logits, target, gamma, alpha_vec, size_average,
                          tile_bytes, vmem_limit_bytes)


def _focal_loss_ref(logits, target, gamma=2, alpha=None, size_average=True):
    """Pure-JAX reference mirroring the PyTorch forward."""
    if logits.ndim > 2:
        n, c = logits.shape[0], logits.shape[1]
        x2d = jnp.transpose(logits.reshape(n, c, -1), (0, 2, 1)).reshape(-1, c)
    else:
        x2d = logits
    t = target.reshape(-1).astype(jnp.int32)
    logp = jax.nn.log_softmax(x2d, axis=1)
    logpt = logp[jnp.arange(t.shape[0]), t]
    pt = jnp.exp(logpt)
    if alpha is not None:
        if isinstance(alpha, (float, int)):
            a = jnp.array([float(alpha), 1.0 - float(alpha)], jnp.float32)
        else:
            a = jnp.asarray(alpha, jnp.float32)
        logpt = logpt * a[t]
    loss = -1.0 * (1.0 - pt) ** gamma * logpt
    return loss.mean() if size_average else loss.sum()


if __name__ == "__main__":
    key = jax.random.PRNGKey(0)
    keys = jax.random.split(key, 12)

    def check(name, actual, expected, rtol=1e-4, atol=1e-5):
        actual = jax.block_until_ready(actual)
        assert jnp.allclose(actual, expected, rtol=rtol, atol=atol), (name, actual, expected)

    C = 4
    alpha = [0.1, 0.2, 0.3, 0.4]

    # 1) default module config (gamma=2, alpha=None, size_average=True), NCHW input
    x = jax.random.normal(keys[0], (2, C, 16, 16), dtype=jnp.float32)
    t = jax.random.randint(keys[1], (2, 16, 16), 0, C, dtype=jnp.int32)
    check("nchw_default", focal_loss(x, t), _focal_loss_ref(x, t))

    # 2) alpha-weighted (per-class list), sum reduction
    check("nchw_alpha", focal_loss(x, t, alpha=alpha, size_average=False),
          _focal_loss_ref(x, t, alpha=alpha, size_average=False), atol=1e-4)

    # 3) spatial size not a multiple of 128 (single full-extent lane tile)
    x3 = jax.random.normal(keys[2], (2, C, 10, 10), dtype=jnp.float32)
    t3 = jax.random.randint(keys[3], (2, 10, 10), 0, C, dtype=jnp.int32)
    check("nchw_hw100_sum", focal_loss(x3, t3, size_average=False),
          _focal_loss_ref(x3, t3, size_average=False), atol=1e-4)

    # 4) multi-tile repacked path with the 2-way spatial split (splits=2)
    x4 = jax.random.normal(keys[4], (2, C, 32, 64), dtype=jnp.float32)
    t4 = jax.random.randint(keys[5], (2, 32, 64), 0, C, dtype=jnp.int32)
    check("nchw_split", focal_loss(x4, t4, tile_bytes=16 * 1024),
          _focal_loss_ref(x4, t4))

    # 5) multi-tile repacked path with a ragged (masked) last tile, no wrapper pad
    x5 = jax.random.normal(keys[6], (2, C, 40, 64), dtype=jnp.float32)
    t5 = jax.random.randint(keys[7], (2, 40, 64), 0, C, dtype=jnp.int32)
    check("nchw_ragged", focal_loss(x5, t5, tile_bytes=16 * 1024),
          _focal_loss_ref(x5, t5))

    # 6) lane-tiled fallback (H*W not 128-divisible) with a ragged last tile
    x6 = jax.random.normal(keys[8], (1, C, 33, 33), dtype=jnp.float32)
    t6 = jax.random.randint(keys[9], (1, 33, 33), 0, C, dtype=jnp.int32)
    check("nchw_lane_ragged", focal_loss(x6, t6, tile_bytes=16 * 1024),
          _focal_loss_ref(x6, t6))

    # 7) 2-D (M, C) path — no wrapper-side transpose, tiled over rows, alpha-weighted
    x7 = jax.random.normal(keys[10], (100, C), dtype=jnp.float32)
    t7 = jax.random.randint(keys[11], (100,), 0, C, dtype=jnp.int32)
    check("2d", focal_loss(x7, t7, alpha=alpha, tile_bytes=512),
          _focal_loss_ref(x7, t7, alpha=alpha))

    print("KERNEL_OK")
</pallas_src>

<mosaic_0001>
module attributes {stable_mosaic.version = 11 : i64} {
  func.func @_focal_loss_kernel(%arg0: i32, %arg1: i32, %arg2: i32, %arg3: memref<1x4x2x128xf32, #tpu.memory_space<vmem>>, %arg4: memref<1x2x128xi32, #tpu.memory_space<vmem>>, %arg5: memref<1x1x1xf32, #tpu.memory_space<vmem>>) attributes {dimension_semantics = [#tpu.dimension_semantics<parallel>, #tpu.dimension_semantics<parallel>, #tpu.dimension_semantics<arbitrary>], iteration_bounds = array<i64: 2, 1, 1>, scalar_prefetch = 0 : i64, scratch_operands = 0 : i64, tpu.core_type = #tpu.core_type<tc>, window_params = [{transform_indices = @transform_0, window_bounds = array<i64: 1, 4, 2, 128>}, {transform_indices = @transform_1, window_bounds = array<i64: 1, 2, 128>}, {transform_indices = @transform_2, window_bounds = array<i64: 1, 1, 1>}]} {
    %c0_i32 = arith.constant 0 : i32
    %0 = arith.cmpi eq, %arg2, %c0_i32 : i32
    %1 = arith.extui %0 : i1 to i32
    %c0_i32_0 = arith.constant 0 : i32
    %2 = arith.cmpi ne, %1, %c0_i32_0 : i32
    scf.if %2 {
      %cst_27 = arith.constant 0.000000e+00 : f32
      %62 = vector.broadcast %cst_27 : f32 to vector<1x1x1xf32>
      %c0_28 = arith.constant 0 : index
      %c0_29 = arith.constant 0 : index
      %c0_30 = arith.constant 0 : index
      %63 = vector.load %arg5[%c0_28, %c0_29, %c0_30] : memref<1x1x1xf32, #tpu.memory_space<vmem>>, vector<1x1x1xf32>
      tpu.vector_store %arg5[%c0_28, %c0_29, %c0_30], %62 {strides = array<i32>} : memref<1x1x1xf32, #tpu.memory_space<vmem>>, vector<1x1x1xf32>,
    } else {
    }
    %c0 = arith.constant 0 : index
    %c0_1 = arith.constant 0 : index
    %c0_2 = arith.constant 0 : index
    %3 = vector.load %arg4[%c0, %c0_1, %c0_2] : memref<1x2x128xi32, #tpu.memory_space<vmem>>, vector<1x2x128xi32>
    %4 = vector.shape_cast %3 : vector<1x2x128xi32> to vector<2x128xi32>
    %c0_3 = arith.constant 0 : index
    %c0_4 = arith.constant 0 : index
    %c0_5 = arith.constant 0 : index
    %c0_6 = arith.constant 0 : index
    %5 = vector.load %arg3[%c0_3, %c0_4, %c0_5, %c0_6] : memref<1x4x2x128xf32, #tpu.memory_space<vmem>>, vector<1x1x2x128xf32>
    %6 = vector.shape_cast %5 : vector<1x1x2x128xf32> to vector<2x128xf32>
    %c0_7 = arith.constant 0 : index
    %c1 = arith.constant 1 : index
    %c0_8 = arith.constant 0 : index
    %c0_9 = arith.constant 0 : index
    %7 = vector.load %arg3[%c0_7, %c1, %c0_8, %c0_9] : memref<1x4x2x128xf32, #tpu.memory_space<vmem>>, vector<1x1x2x128xf32>
    %8 = vector.shape_cast %7 : vector<1x1x2x128xf32> to vector<2x128xf32>
    %c0_10 = arith.constant 0 : index
    %c2 = arith.constant 2 : index
    %c0_11 = arith.constant 0 : index
    %c0_12 = arith.constant 0 : index
    %9 = vector.load %arg3[%c0_10, %c2, %c0_11, %c0_12] : memref<1x4x2x128xf32, #tpu.memory_space<vmem>>, vector<1x1x2x128xf32>
    %10 = vector.shape_cast %9 : vector<1x1x2x128xf32> to vector<2x128xf32>
    %c0_13 = arith.constant 0 : index
    %c3 = arith.constant 3 : index
    %c0_14 = arith.constant 0 : index
    %c0_15 = arith.constant 0 : index
    %11 = vector.load %arg3[%c0_13, %c3, %c0_14, %c0_15] : memref<1x4x2x128xf32, #tpu.memory_space<vmem>>, vector<1x1x2x128xf32>
    %12 = vector.shape_cast %11 : vector<1x1x2x128xf32> to vector<2x128xf32>
    %13 = arith.maximumf %6, %8 : vector<2x128xf32>
    %14 = arith.maximumf %13, %10 : vector<2x128xf32>
    %15 = arith.maximumf %14, %12 : vector<2x128xf32>
    %16 = arith.subf %6, %15 : vector<2x128xf32>
    %17 = math.exp %16 : vector<2x128xf32>
    %c0_i32_16 = arith.constant 0 : i32
    %18 = vector.broadcast %c0_i32_16 : i32 to vector<2x128xi32>
    %19 = arith.cmpi eq, %4, %18 : vector<2x128xi32>
    %cst = arith.constant 0.000000e+00 : f32
    %20 = vector.broadcast %cst : f32 to vector<2x128xf32>
    %21 = arith.select %19, %16, %20 : vector<2x128xi1>, vector<2x128xf32>
    %cst_17 = arith.constant 0.000000e+00 : f32
    %22 = vector.broadcast %cst_17 : f32 to vector<2x128xf32>
    %23 = arith.select %19, %17, %22 : vector<2x128xi1>, vector<2x128xf32>
    %24 = arith.subf %8, %15 : vector<2x128xf32>
    %25 = math.exp %24 : vector<2x128xf32>
    %26 = arith.addf %17, %25 : vector<2x128xf32>
    %c1_i32 = arith.constant 1 : i32
    %27 = vector.broadcast %c1_i32 : i32 to vector<2x128xi32>
    %28 = arith.cmpi eq, %4, %27 : vector<2x128xi32>
    %29 = arith.select %28, %24, %21 : vector<2x128xi1>, vector<2x128xf32>
    %30 = arith.select %28, %25, %23 : vector<2x128xi1>, vector<2x128xf32>
    %31 = arith.subf %10, %15 : vector<2x128xf32>
    %32 = math.exp %31 : vector<2x128xf32>
    %33 = arith.addf %26, %32 : vector<2x128xf32>
    %c2_i32 = arith.constant 2 : i32
    %34 = vector.broadcast %c2_i32 : i32 to vector<2x128xi32>
    %35 = arith.cmpi eq, %4, %34 : vector<2x128xi32>
    %36 = arith.select %35, %31, %29 : vector<2x128xi1>, vector<2x128xf32>
    %37 = arith.select %35, %32, %30 : vector<2x128xi1>, vector<2x128xf32>
    %38 = arith.subf %12, %15 : vector<2x128xf32>
    %39 = math.exp %38 : vector<2x128xf32>
    %40 = arith.addf %33, %39 : vector<2x128xf32>
    %c3_i32 = arith.constant 3 : i32
    %41 = vector.broadcast %c3_i32 : i32 to vector<2x128xi32>
    %42 = arith.cmpi eq, %4, %41 : vector<2x128xi32>
    %43 = arith.select %42, %38, %36 : vector<2x128xi1>, vector<2x128xf32>
    %44 = arith.select %42, %39, %37 : vector<2x128xi1>, vector<2x128xf32>
    %45 = math.log %40 : vector<2x128xf32>
    %46 = arith.subf %43, %45 : vector<2x128xf32>
    %47 = arith.divf %44, %40 : vector<2x128xf32>
    %cst_18 = arith.constant 1.000000e+00 : f32
    %48 = vector.broadcast %cst_18 : f32 to vector<2x128xf32>
    %49 = arith.subf %48, %47 : vector<2x128xf32>
    %50 = arith.mulf %49, %49 : vector<2x128xf32>
    %cst_19 = arith.constant 0.000000e+00 : f32
    %51 = vector.broadcast %cst_19 : f32 to vector<2x128xf32>
    %52 = arith.subf %51, %50 : vector<2x128xf32>
    %53 = arith.mulf %52, %46 : vector<2x128xf32>
    %c0_20 = arith.constant 0 : index
    %c0_21 = arith.constant 0 : index
    %c0_22 = arith.constant 0 : index
    %54 = vector.load %arg5[%c0_20, %c0_21, %c0_22] : memref<1x1x1xf32, #tpu.memory_space<vmem>>, vector<1x1x1xf32>
    %55 = vector.shape_cast %53 : vector<2x128xf32> to vector<1x2x128xf32>
    %cst_23 = arith.constant dense<0.000000e+00> : vector<1xf32>
    %56 = vector.multi_reduction <add>, %55, %cst_23 [1, 2] : vector<1x2x128xf32> to vector<1xf32>
    %57 = vector.shape_cast %56 : vector<1xf32> to vector<1x1x1xf32>
    %58 = vector.extract %57[0, 0, 0] : f32 from vector<1x1x1xf32>
    %59 = vector.broadcast %58 : f32 to vector<1x1x1xf32>
    %60 = arith.addf %54, %59 : vector<1x1x1xf32>
    %c0_24 = arith.constant 0 : index
    %c0_25 = arith.constant 0 : index
    %c0_26 = arith.constant 0 : index
    %61 = vector.load %arg5[%c0_24, %c0_25, %c0_26] : memref<1x1x1xf32, #tpu.memory_space<vmem>>, vector<1x1x1xf32>
    tpu.vector_store %arg5[%c0_24, %c0_25, %c0_26], %60 {strides = array<i32>} : memref<1x1x1xf32, #tpu.memory_space<vmem>>, vector<1x1x1xf32>,
    return
  }
  func.func @transform_0(%arg0: i32, %arg1: i32, %arg2: i32) -> (i32, i32, i32, i32) {
    %c1_i32 = arith.constant 1 : i32
    %0 = arith.muli %arg1, %c1_i32 : i32
    %1 = arith.addi %0, %arg2 : i32
    %c0_i32 = arith.constant 0 : i32
    %c0_i32_0 = arith.constant 0 : i32
    %c0_i32_1 = arith.constant 0 : i32
    return %arg0, %c0_i32, %1, %c0_i32_0 : i32, i32, i32, i32
  }
  func.func @transform_1(%arg0: i32, %arg1: i32, %arg2: i32) -> (i32, i32, i32) {
    %c1_i32 = arith.constant 1 : i32
    %0 = arith.muli %arg1, %c1_i32 : i32
    %1 = arith.addi %0, %arg2 : i32
    %c0_i32 = arith.constant 0 : i32
    %c0_i32_0 = arith.constant 0 : i32
    return %arg0, %1, %c0_i32 : i32, i32, i32
  }
  func.func @transform_2(%arg0: i32, %arg1: i32, %arg2: i32) -> (i32, i32, i32) {
    %c1_i32 = arith.constant 1 : i32
    %0 = arith.muli %arg0, %c1_i32 : i32
    %1 = arith.addi %0, %arg1 : i32
    %c0_i32 = arith.constant 0 : i32
    %c0_i32_0 = arith.constant 0 : i32
    %c0_i32_1 = arith.constant 0 : i32
    return %1, %c0_i32, %c0_i32_0 : i32, i32, i32
  }
}

</mosaic_0001>

<bundles_post_ra>
// kernel: tpu_custom_call.1
= control target key start
LH: loop header
LB: loop body
LE: loop exit
PB: predicated region body
PF: predicated region fallthrough
CT: control target
= control target key end

     0   :  { %7 = vsyncpa [#allocation3], 0  ;;  %s802_s0 = inlined_call_operand.hbm [shape: f32[2,4,2,128], index: 0, kind: input, shape index: {}]   ;;  %s803_s1 = inlined_call_operand.hbm [shape: s32[2,2,128], index: 1, kind: input, shape index: {}]   ;;  %s804_s2 = inlined_call_operand.vmem [shape: f32[2,1,1], index: 2, kind: output, shape index: {}]  }
   0x1   :  { %9 = vsyncpa [#allocation3 + $0x1], 0 }
   0x2   :  { %10 = vsyncpa [#allocation5], 0 }
   0x3   :  { %12 = vsyncpa [#allocation5 + $0x1], 0  ;;  %s636_s9 = smov 0   ;;  %s638_s10 = smov 0  }
   0x4   :  { %s640_s11 = smov 0   ;;  %s642_s12 = smov 0  }
   0x5   :  { %s644_s13 = smov 0   ;;  %s646_s14 = smov 0  }
   0x6 LB: > { %s405_s15 = sadd.s32 4294967295, %s614_s14   ;;  %s37_s16 = sadd.s32 1, %s610_s13  ;;  %s614_s14 = sphi %s646_s14, %s18_s14   ;;  %s610_s13 = sphi %s644_s13, %s816_s13   ;;  %s606_s12 = sphi %s642_s12, %s815_s12   ;;  %s602_s11 = sphi %s640_s11, %s814_s11   ;;  %s598_s10 = sphi %s638_s10, %s813_s10   ;;  %s594_s9 = sphi %s636_s9, %s812_s9  }
   0x7   : > { %p39_p0 = scmp.ge.s32.totalorder %s37_s16, 2  ;;  %s48_s17 = sadd.s32 1, %s602_s11 }
   0x8   : > { %p55_p1 = scmp.ne.s32.totalorder %s602_s11, %s598_s10  ;;  %p56_p2 = scmp.eq.s32.totalorder %s614_s14, 0 }
   0x9   : > { %s818_s16 = smov (%p39_p0, %s37_s16), 0  ;;  %p61_p4 = scmp.ne.s32.totalorder %s598_s10, %s594_s9 }
   0xa   : > { %p672_p3 = por %p56_p2, %p55_p1  ;;  %s43_s19 = ssub.s32 %s610_s13, %s818_s16 }
   0xb   : > { %p62_p5 = scmp.eq.s32.totalorder %s405_s15, 0  ;;  %p46_p6 = scmp.eq.s32.totalorder %s43_s19, 0 }
   0xc   : > { %p436_p8 = scmp.lt.s32.totalorder %s614_s14, 2  ;;  %s688_s22 = sand.u32 1, %s602_s11  }
   0xd   : > { %p679_p7 = por %p62_p5, %p61_p4  ;;  %s422_s23 = sshll.u32 %s610_s13, 7 }
   0xe   : > { %s685_s21 = scalar_select %p46_p6, %s602_s11, %s48_s17  }
   0xf   : > { %s807_s20 = scalar_select %p679_p7, 1, 0 }
  0x10   : > { %s409_s24 = sshll.u32 %s688_s22, 3  ;;  %s695_s27 = scalar_lea.hbm %s802_s0, %s422_s23 }
  0x11   : > { %s147_s28 = scalar_lea.vmem [#allocation2], %s409_s24  ;;  %p699_p9 = pnand %p436_p8, %p672_p3 }
  0x12   : > { %s156_s29 = sshll.u32 %s147_s28, 4  ;;  %s144_s3 = scalar_lea.sflag [#allocation3], %s688_s22  ;;  %s703_s29 = int_to_ptr.vmem [resolvable:$true] %s156_s29 }
  0x13   : > { %s500_s4 = scalar_lea.hbm %s695_s27, 128  ;;  %p502_p11 = pneg %p699_p9 }
  0x14   : > { %p501_p10 = scmp.ne.s32.totalorder %s695_s27, %s500_s4  ;;  %s505_s7 = scalar_lea.hbm %s802_s0, 256 }
  0x15   : > { %p506_p0 = scmp.lt.u32.totalorder %s695_s27, %s802_s0  ;;  %p507_p1 = scmp.lt.u32.totalorder %s505_s7, %s500_s4 }
  0x16   : > { %p503_p12 = pnand %p502_p11, %p501_p10  ;;  %p509_p3 = scmp.lt.u32.totalorder %s500_s4, %s695_s27 }
  0x17   : > { %p508_p2 = por %p507_p1, %p506_p0 }
  0x18   : > { %p504_p13 = pneg %p503_p12 }
  0x19   : > { %p510_p4 = por %p509_p3, %p508_p2 }
  0x1b   : > { %p511_p5 = pnand %p510_p4, %p504_p13 }
  0x1d   : > { %514 = shalt.err (!%p511_p5)
}
  0x1e   : > { %s515_s15 = scalar_lea.vmem %s703_s29, 128  ;;  %s616_s17 = smov [#allocation2]  }
  0x1f   : > { %p516_p6 = scmp.ne.s32.totalorder %s703_s29, %s515_s15  ;;  %s520_s18 = sshll.u32 %s616_s17, 4  ;;  %s521_s18 = int_to_ptr.vmem [resolvable:$false] %s520_s18 }
  0x20   : > { %s522_s19 = scalar_lea.vmem %s521_s18, 256  ;;  %p523_p12 = scmp.lt.s32.totalorder %s703_s29, %s521_s18 }
  0x21   : > { %p518_p8 = pnand %p516_p6, %p502_p11  ;;  %p524_p0 = scmp.lt.s32.totalorder %s522_s19, %s515_s15 }
  0x23   : > { %p519_p10 = pneg %p518_p8  ;;  %p525_p1 = por %p524_p0, %p523_p12 }
  0x25   : > { %p526_p2 = pnand %p525_p1, %p519_p10 }
  0x27   : > { %529 = shalt.err (!%p526_p2)
}
  0x28   : > { %s617_s23 = smov 32   ;;  %s618_s24 = smov 2  }
  0x29   : > { %432 = dma.hbm_to_vmem [thread:$0]  (!%p699_p9), %s695_s27, 128, %s703_s29, %s144_s3, %s617_s23, %s617_s23, %s618_s24  }
  0x2a   : > { %p414_p13 = scmp.ge.s32.totalorder %s614_s14, 1  ;;  %p184_p3 = scmp.lt.s32.totalorder %s614_s14, 3 }
  0x2b   : > { %s412_s25 = sshll.u32 %s688_s22, 1  ;;  %s413_s28 = sshll.u32 %s610_s13, 5 }
  0x2c   : > { %p736_p4 = pnand %p414_p13, %p184_p3  ;;  %s170_s4 = scalar_lea.vmem [#allocation4], %s412_s25 }
  0x2d   : > { %s179_s5 = sshll.u32 %s170_s4, 4  ;;  %s744_s8 = scalar_lea.hbm %s803_s1, %s413_s28  ;;  %s180_s5 = int_to_ptr.vmem [resolvable:$true] %s179_s5 }
  0x2e   : > { %s809_s26 = scalar_select %p736_p4, 1, 0 }
  0x2f   : > { %s167_s27 = scalar_lea.sflag [#allocation5], %s688_s22  ;;  %s530_s29 = scalar_lea.hbm %s744_s8, 32 }
  0x30   : > { %p531_p5 = scmp.ne.s32.totalorder %s744_s8, %s530_s29  ;;  %s535_s15 = scalar_lea.hbm %s803_s1, 64 }
  0x31   : > { %p536_p10 = scmp.lt.u32.totalorder %s744_s8, %s803_s1  ;;  %p537_p12 = scmp.lt.u32.totalorder %s535_s15, %s530_s29 }
  0x32   : > { %p533_p6 = pnand %p531_p5, %p502_p11  ;;  %p539_p1 = scmp.lt.u32.totalorder %s530_s29, %s744_s8 }
  0x33   : > { %p538_p0 = por %p537_p12, %p536_p10 }
  0x34   : > { %p534_p8 = pneg %p533_p6 }
  0x35   : > { %p540_p2 = por %p539_p1, %p538_p0 }
  0x37   : > { %p541_p13 = pnand %p540_p2, %p534_p8 }
  0x39   : > { %544 = shalt.err (!%p541_p13)
}
  0x3a   : > { %s545_s22 = scalar_lea.vmem %s180_s5, 32  ;;  %s619_s19 = smov [#allocation4]  }
  0x3b   : > { %p546_p3 = scmp.ne.s32.totalorder %s180_s5, %s545_s22  ;;  %s550_s23 = sshll.u32 %s619_s19, 4  ;;  %s551_s23 = int_to_ptr.vmem [resolvable:$false] %s550_s23 }
  0x3c   : > { %s552_s24 = scalar_lea.vmem %s551_s23, 64  ;;  %p553_p7 = scmp.lt.s32.totalorder %s180_s5, %s551_s23 }
  0x3d   : > { %p548_p5 = pnand %p546_p3, %p502_p11  ;;  %p554_p4 = scmp.lt.s32.totalorder %s552_s24, %s545_s22 }
  0x3f   : > { %p549_p6 = pneg %p548_p5  ;;  %p555_p10 = por %p554_p4, %p553_p7 }
  0x41   : > { %p556_p12 = pnand %p555_p10, %p549_p6 }
  0x43   : > { %559 = shalt.err (!%p556_p12)
}
  0x44   : > { %435 = dma.hbm_to_vmem [thread:$0]  (!%p699_p9), %s744_s8, 32, %s180_s5, %s167_s27  }
  0x45   : > { %p810_p8 = scmp.ne.s32.totalorder %s809_s26, 0 }
  0x46   : > { %s190_s25 = sand.u32 (!%p810_p8), 1, %s598_s10   ;;  %p811_p11 = scmp.ne.s32.totalorder (!%p810_p8), %s807_s20, 0 }
  0x47   : > { %188 = sbr.rel (%p810_p8) target bundleno = 342 (0x156), region = 28  ;;  %s415_s28 = sshll.u32 (!%p810_p8), %s190_s25, 3 }
  0x48   : > { %s191_s4 = scalar_lea.sflag (!%p810_p8), [#allocation3], %s190_s25  ;;  %s194_s6 = scalar_lea.vmem (!%p810_p8), [#allocation2], %s415_s28 }
  0x4e   : > { %585 = dma.done.wait (%p811_p11), %s191_s4, 128  }
  0x4f   : > { %587 = vsyncadd (%p811_p11), %s191_s4, 4294967168  ;;  %s416_s7 = sshll.u32 %s190_s25, 1  ;;  %s200_s29 = scalar_lea.sflag [#allocation5], %s190_s25 }
  0x50   : > { %s203_s30 = scalar_lea.vmem [#allocation4], %s416_s7 }
  0x51   : > { %589 = dma.done.wait (%p811_p11), %s200_s29, 32  }
  0x52   : > { %591 = vsyncadd (%p811_p11), %s200_s29, 4294967264  ;;  %v242_v0 = vld [vmem:[%s194_s6] sm:$0x3]  ;;  %v417_v1 = vld [vmem:[%s194_s6 + $0x2] sm:$0x3]  ;;  %vm289_vm4 = vcmask 1041408  }
  0x53   : > { %v418_v2 = vld [vmem:[%s194_s6 + $0x4] sm:$0x3]  ;;  %v249_v3 = vmax.f32 %v242_v0, %v417_v1  ;;  %v419_v4 = vld [vmem:[%s194_s6 + $0x6] sm:$0x3]  ;;  %v241_v18 = vld [vmem:[%s203_s30] sm:$0x3] }
  0x54   : > { %vm255_vm0 = vcmp.eq.s32.totalorder %v241_v18, 0  ;;  %vm262_vm1 = vcmp.eq.s32.totalorder %v241_v18, 1  ;;  %vm269_vm2 = vcmp.eq.s32.totalorder %v241_v18, 2  ;;  %vm276_vm3 = vcmp.eq.s32.totalorder %v241_v18, 3  ;;  %p231_p7 = scmp.lt.s32.totalorder %s606_s12, 1 }
  0x55   : > { %v250_v5 = vmax.f32 %v249_v3, %v418_v2  ;;  %vm239_vm5 = vcmask 0   ;;  %v620_v41 = vmov 0.0  }
  0x56   : > { %s820_s12 = smov (!%p231_p7, %s606_s12), 1 }
  0x57   : > { %v251_v6 = vmax.f32 %v250_v5, %v419_v4  ;;  %s233_s5 = scalar_lea.vmem %s804_s2, %s820_s12 }
  0x58   : > { %240 = vst.msk [vmem:[%s233_s5] sm:$0x1] %vm239_vm5, %v620_v41 }
  0x59   : > { %v252_v7 = vsub.f32 %v242_v0, %v251_v6  ;;  %v258_v8 = vsub.f32 %v417_v1, %v251_v6  ;;  %v265_v9 = vsub.f32 %v418_v2, %v251_v6  ;;  %v272_v10 = vsub.f32 %v419_v4, %v251_v6 }
  0x5b   : > { %v253_v11 = vmul.f32 1.442695, %v252_v7  ;;  %v259_v12 = vmul.f32 1.442695, %v258_v8  ;;  %v266_v13 = vmul.f32 1.442695, %v265_v9 }
  0x5c   : > { %v273_v14 = vmul.f32 1.442695, %v272_v10  ;;  %v256_v25 = vsel %vm255_vm0, %v252_v7, 0.0 }
  0x5d   : > { %488 = vpow2.f32 %v253_v11  ;;  %v263_v27 = vsel %vm262_vm1, %v258_v8, %v256_v25 }
  0x5e   : > { %490 = vpow2.f32 %v259_v12  ;;  %v270_v30 = vsel %vm269_vm2, %v265_v9, %v263_v27 }
  0x5f   : > { %492 = vpow2.f32 %v266_v13  ;;  %v277_v34 = vsel %vm276_vm3, %v272_v10, %v270_v30  ;;  %v288_v49 = vld [vmem:[%s233_s5] sm:$0x1] }
  0x60   : > { %494 = vpow2.f32 %v273_v14 }
  0x67   : > { %v489_v15 = vpop.eup %488 }
  0x68   : > { %v491_v16 = vpop.eup %490  ;;  %v257_v23 = vsel %vm255_vm0, %v489_v15, 0.0 }
  0x69   : > { %v493_v17 = vpop.eup %492  ;;  %v261_v19 = vadd.f32 %v491_v16, %v489_v15  ;;  %v264_v24 = vsel %vm262_vm1, %v491_v16, %v257_v23 }
  0x6a   : > { %v495_v20 = vpop.eup %494  ;;  %v271_v26 = vsel %vm269_vm2, %v493_v17, %v264_v24 }
  0x6b   : > { %v268_v21 = vadd.f32 %v493_v17, %v261_v19  ;;  %v278_v28 = vsel %vm276_vm3, %v495_v20, %v271_v26 }
  0x6d   : > { %v275_v22 = vadd.f32 %v495_v20, %v268_v21 }
  0x6f   : > { %496 = vlog2.f32 %v275_v22 }
  0x70   : > { %498 = vrcp.f32 %v275_v22 }
  0x79   : > { %v497_v29 = vpop.eup %496 }
  0x7a   : > { %v499_v31 = vpop.eup %498  ;;  %v280_v32 = vmul.f32 0.6931472, %v497_v29 }
  0x7b   : > { %v283_v33 = vmul.f32 %v499_v31, %v278_v28 }
  0x7c   : > { %v281_v36 = vsub.f32 %v277_v34, %v280_v32 }
  0x7d   : > { %v284_v35 = vsub.f32 1.0, %v283_v33 }
  0x7f   : > { %v285_v37 = vmul.f32 %v284_v35, %v284_v35 }
  0x81   : > { %v286_v38 = vsub.f32 0.0, %v285_v37 }
  0x83   : > { %v287_v39 = vmul.f32 %v286_v38, %v281_v36 }
  0x85   : > { %v290_v40 = vsel %vm289_vm4, %v287_v39, 0.0 }
  0x86   : > { %291 = vadd.xlane.f32.xlu0 %v290_v40 }
 0x113   : > { %v292_v42 = vpop.xlane.xlu0 %291 }
 0x114   : > { %v293_v43 = vrot.slane %v292_v42, 4 }
 0x116   : > { %v294_v44 = vadd.f32 %v293_v43, %v292_v42 }
 0x118   : > { %v295_v45 = vrot.slane %v294_v44, 2 }
 0x11a   : > { %v296_v46 = vadd.f32 %v295_v45, %v294_v44 }
 0x11c   : > { %v297_v47 = vrot.slane %v296_v46, 1 }
 0x11e   : > { %v298_v48 = vadd.f32 %v297_v47, %v296_v46 }
 0x120   : > { %423 = vpush %v298_v48 }
 0x151   : > { %s424_s8 = spop %423 }
 0x152   : > { %v300_v50 = vstv %s424_s8 }
 0x153   : > { %v301_v51 = vadd.f32 %v300_v50, %v288_v49 }
 0x155   : > { %303 = vst.msk [vmem:[%s233_s5] sm:$0x1] %vm239_vm5, %v301_v51 }
 0x156 PF: > { %s18_s14 = sadd.s32 1, %s614_s14   ;;  %s812_s9 = smov %s598_s10 }
 0x157   : > { %p15_p9 = scmp.ge.s32.totalorder %s18_s14, 4   ;;  %s813_s10 = smov %s602_s11 }
 0x158   : > { %s814_s11 = smov %s685_s21  ;;  %s815_s12 = smov %s610_s13 }
 0x159   : > { %s816_s13 = smov %s818_s16  ;;  %17 = sbr.rel (!%p15_p9) target bundleno = 6 (0x6), region = 88 }
 0x160   :  { %324 = vsyncpa [#allocation3], 1 }
 0x161   :  { %326 = vsyncpa [#allocation3 + $0x1], 1 }
 0x162   :  { %327 = vsyncpa [#allocation5], 1 }
 0x163   :  { %329 = vsyncpa [#allocation5 + $0x1], 1 }

</bundles_post_ra>
